<compile_context>
chip_gen: v7x
topology: tpu7x:2x2x1
jax: 0.10.0
libtpu: 0.0.40
codegen_flags: <defaults>
</compile_context>

<pallas_src>
import jax
import jax.numpy as jnp
from jax.experimental import pallas as pl
from jax.experimental.pallas import tpu as pltpu


def _maxpool_rows_kernel(x_ref, o_ref):
    # x_ref: (TR, 2*W)  super-rows: [input row 2r | input row 2r+1]
    # o_ref: (TR, Wo)   pooled output rows
    two_w = x_ref.shape[1]
    w = two_w // 2
    wo = o_ref.shape[1]

    # ---- Pool over H: elementwise max of the two halves of each super-row.
    #      (static, unit-stride ref slices -> plain vector loads)
    top = x_ref[:, pl.ds(0, w)]
    bot = x_ref[:, pl.ds(w, w)]
    h = jnp.maximum(top, bot)                       # (TR, W)

    # ---- Pool over W: gather even / odd columns with 0/1 selection matmuls
    #      (lane compaction without strided lane slices), then take the max.
    r = jax.lax.broadcasted_iota(jnp.int32, (w, wo), 0)
    c = jax.lax.broadcasted_iota(jnp.int32, (w, wo), 1)
    sel_even = (r == 2 * c).astype(h.dtype)         # (W, Wo) exact 0/1
    sel_odd = (r == 2 * c + 1).astype(h.dtype)
    left = jnp.dot(h, sel_even, preferred_element_type=jnp.float32)
    right = jnp.dot(h, sel_odd, preferred_element_type=jnp.float32)
    o_ref[...] = jnp.maximum(left, right).astype(o_ref.dtype)


def _pick_row_tile(num_rows, row_bytes, target_bytes=2 * 1024 * 1024):
    """Largest row tile that divides num_rows, is a multiple of 8 (f32 sublane
    tile) and keeps one input block near `target_bytes` (v7x-safe once the
    pipeline double-buffers it)."""
    if num_rows * row_bytes <= target_bytes:
        return num_rows
    cap = int(min(num_rows, max(8, target_bytes // row_bytes)))
    best = 0
    for t in range(8, cap + 1, 8):
        if num_rows % t == 0:
            best = t
    return best if best > 0 else num_rows


def maxpool2x2_rows(x_rows, wo):
    """x_rows: (R, 2*W) super-rows -> (R, Wo) pooled rows (Pallas hot path)."""
    rows, two_w = x_rows.shape
    tr = _pick_row_tile(rows, two_w * x_rows.dtype.itemsize)
    return pl.pallas_call(
        _maxpool_rows_kernel,
        out_shape=jax.ShapeDtypeStruct((rows, wo), x_rows.dtype),
        grid=(rows // tr,),
        in_specs=[pl.BlockSpec((tr, two_w), lambda i: (i, 0))],
        out_specs=pl.BlockSpec((tr, wo), lambda i: (i, 0)),
        compiler_params=pltpu.CompilerParams(
            dimension_semantics=("parallel",)),
    )(x_rows)


@jax.jit
def naive_model_forward(x_nchw):
    """Equivalent of NaiveModel.forward: MaxPool2d(2, 2) on NCHW input."""
    n, c, h, w = x_nchw.shape
    assert h % 2 == 0 and w % 2 == 0, "MaxPool2d(2,2) needs even H and W"
    ho, wo = h // 2, w // 2
    # Free, contiguous reshapes (no transposes, no extra HBM traffic).
    x_rows = x_nchw.reshape(n * c * ho, 2 * w)
    y_rows = maxpool2x2_rows(x_rows, wo)
    return y_rows.reshape(n, c, ho, wo)


if __name__ == "__main__":
    key = jax.random.PRNGKey(0)
    N, C, H, W = 2, 4, 16, 16
    x = jax.random.normal(key, (N, C, H, W), dtype=jnp.float32)
    # Keep values exactly representable in bf16 so the 0/1 selection matmul is
    # bit-exact regardless of the backend's f32 matmul mode (incl. interpret).
    x = x.astype(jnp.bfloat16).astype(jnp.float32)

    out = jax.block_until_ready(naive_model_forward(x))

    # Pure-JAX reference for MaxPool2d(2, 2).
    ref = x.reshape(N, C, H // 2, 2, W // 2, 2).max(axis=(3, 5))

    assert out.shape == ref.shape, (out.shape, ref.shape)
    assert out.dtype == x.dtype
    assert jnp.allclose(out, ref, atol=1e-6, rtol=1e-6), "maxpool mismatch"
    print("KERNEL_OK")
</pallas_src>

<mosaic_0001>
module attributes {stable_mosaic.version = 11 : i64} {
  func.func @_maxpool_rows_kernel(%arg0: i32, %arg1: memref<64x32xf32, #tpu.memory_space<vmem>>, %arg2: memref<64x8xf32, #tpu.memory_space<vmem>>) attributes {dimension_semantics = [#tpu.dimension_semantics<parallel>], iteration_bounds = array<i64: 1>, scalar_prefetch = 0 : i64, scratch_operands = 0 : i64, tpu.core_type = #tpu.core_type<tc>, window_params = [{transform_indices = @transform_0, window_bounds = array<i64: 64, 32>}, {transform_indices = @transform_1, window_bounds = array<i64: 64, 8>}]} {
    %c0 = arith.constant 0 : index
    %c0_0 = arith.constant 0 : index
    %0 = vector.load %arg1[%c0, %c0_0] : memref<64x32xf32, #tpu.memory_space<vmem>>, vector<64x16xf32>
    %c0_1 = arith.constant 0 : index
    %c16 = arith.constant 16 : index
    %1 = vector.load %arg1[%c0_1, %c16] : memref<64x32xf32, #tpu.memory_space<vmem>>, vector<64x16xf32>
    %2 = arith.maximumf %0, %1 : vector<64x16xf32>
    %3 = tpu.iota {dimensions = array<i32: 0>} : vector<16x8xi32>
    %4 = tpu.iota {dimensions = array<i32: 1>} : vector<16x8xi32>
    %c2_i32 = arith.constant 2 : i32
    %5 = vector.broadcast %c2_i32 : i32 to vector<16x8xi32>
    %6 = arith.muli %5, %4 : vector<16x8xi32>
    %7 = arith.cmpi eq, %3, %6 : vector<16x8xi32>
    %8 = arith.extui %7 : vector<16x8xi1> to vector<16x8xi32>
    %9 = arith.sitofp %8 : vector<16x8xi32> to vector<16x8xf32>
    %c2_i32_2 = arith.constant 2 : i32
    %10 = vector.broadcast %c2_i32_2 : i32 to vector<16x8xi32>
    %11 = arith.muli %10, %4 : vector<16x8xi32>
    %c1_i32 = arith.constant 1 : i32
    %12 = vector.broadcast %c1_i32 : i32 to vector<16x8xi32>
    %13 = arith.addi %11, %12 : vector<16x8xi32>
    %14 = arith.cmpi eq, %3, %13 : vector<16x8xi32>
    %15 = arith.extui %14 : vector<16x8xi1> to vector<16x8xi32>
    %16 = arith.sitofp %15 : vector<16x8xi32> to vector<16x8xf32>
    %cst = arith.constant dense<0.000000e+00> : vector<64x8xf32>
    %17 = tpu.matmul %2, %9, %cst {dimension_numbers = #tpu.dot_dimension_numbers<[1], [0], [0], [1], [0, 0, 1, 1], [], []>} : vector<64x16xf32>, vector<16x8xf32>, vector<64x8xf32> -> vector<64x8xf32>
    %cst_3 = arith.constant dense<0.000000e+00> : vector<64x8xf32>
    %18 = tpu.matmul %2, %16, %cst_3 {dimension_numbers = #tpu.dot_dimension_numbers<[1], [0], [0], [1], [0, 0, 1, 1], [], []>} : vector<64x16xf32>, vector<16x8xf32>, vector<64x8xf32> -> vector<64x8xf32>
    %19 = arith.maximumf %17, %18 : vector<64x8xf32>
    %c0_4 = arith.constant 0 : index
    %c0_5 = arith.constant 0 : index
    %20 = vector.load %arg2[%c0_4, %c0_5] : memref<64x8xf32, #tpu.memory_space<vmem>>, vector<64x8xf32>
    tpu.vector_store %arg2[%c0_4, %c0_5], %19 {strides = array<i32>} : memref<64x8xf32, #tpu.memory_space<vmem>>, vector<64x8xf32>,
    return
  }
  func.func @transform_0(%arg0: i32) -> (i32, i32) {
    %c0_i32 = arith.constant 0 : i32
    %c0_i32_0 = arith.constant 0 : i32
    return %arg0, %c0_i32 : i32, i32
  }
  func.func @transform_1(%arg0: i32) -> (i32, i32) {
    %c0_i32 = arith.constant 0 : i32
    %c0_i32_0 = arith.constant 0 : i32
    return %arg0, %c0_i32 : i32, i32
  }
}

</mosaic_0001>

<bundles_post_ra>
// kernel: naive_model_forward.1
= control target key start
LH: loop header
LB: loop body
LE: loop exit
PB: predicated region body
PF: predicated region fallthrough
CT: control target
= control target key end

     0   :  { %v57_v2 = vlaneseq  ;;  %s457_s10 = smov 112   ;;  %s540_s0 = inlined_call_operand.vmem [shape: f32[64,32], index: 0, kind: input, shape index: {}]   ;;  %s541_s1 = inlined_call_operand.hbm [shape: f32[64,8], index: 1, kind: output, shape index: {}]  }
   0x1   :  { %v9_v0 = vld [vmem:[%s540_s0] sm:$0xff]  ;;  %v11_v1 = vld [vmem:[%s540_s0 + $0x10] sm:$0xff]  ;;  %v10_v3 = vld [vmem:[%s540_s0 + $0x8] sm:$0xff] }
   0x2   :  { %25 = vrot.lane.b32.xlu0 %v9_v0, %s457_s10  ;;  %29 = vrot.lane.b32.xlu1 %v11_v1, %s457_s10  ;;  %v12_v4 = vld [vmem:[%s540_s0 + $0x18] sm:$0xff]  ;;  %v58_v5 = vshrl.u32 %v57_v2, 7  ;;  %v61_v6 = vand.u32 127, %v57_v2 }
   0x3   :  { %6 = vsyncpa [#allocation3], 0  ;;  %v13_v9 = vld [vmem:[%s540_s0 + $0x20] sm:$0xff]  ;;  %v14_v10 = vld [vmem:[%s540_s0 + $0x28] sm:$0xff]  ;;  %v458_v12 = vmov 1.0|1.0  }
   0x4   :  { %v59_v7 = vadd.s32 8, %v58_v5  ;;  %v62_v8 = vmul.u32 2, %v61_v6  ;;  %v15_v13 = vld [vmem:[%s540_s0 + $0x30] sm:$0xff]  ;;  %v16_v14 = vld [vmem:[%s540_s0 + $0x38] sm:$0xff]  ;;  %vm76_vm6 = vcmask 130048   ;;  %vm319_vm7 = vcmask 64512  }
   0x5   :  { %s459_s0 = smov [#allocation2]  }
   0x6   :  { %27 = vrot.lane.b32.xlu0 %v10_v3, %s457_s10  ;;  %31 = vrot.lane.b32.xlu1 %v12_v4, %s457_s10  ;;  %vm63_vm0 = vcmp.eq.s32.totalorder %v58_v5, %v62_v8  ;;  %vm64_vm1 = vcmp.eq.s32.totalorder %v59_v7, %v62_v8  ;;  %v69_v11 = vadd.s32 1, %v62_v8  ;;  %s333_s23 = sshll.u32 %s459_s0, 4  ;;  %s334_s23 = int_to_ptr.vmem [resolvable:$true] %s333_s23 }
   0x7   :  { %vm420_vm2 = vmpackc.low %vm64_vm1, %vm63_vm0  ;;  %s433_s24 = scalar_lea.vmem %s334_s23, 1024  ;;  %p438_p1 = scmp.lt.s32.totalorder %s334_s23, %s334_s23 }
   0x8   :  { %421 = vmatprep.subr.msk.bf16.mxu0 %vm420_vm2, %v458_v12  ;;  %vm70_vm3 = vcmp.eq.s32.totalorder %v58_v5, %v69_v11  ;;  %vm71_vm4 = vcmp.eq.s32.totalorder %v59_v7, %v69_v11  ;;  %p434_p0 = scmp.ne.s32.totalorder %s334_s23, %s433_s24  ;;  %p439_p2 = scmp.lt.s32.totalorder %s433_s24, %s433_s24 }
   0x9   :  { %vm424_vm5 = vmpackc.low %vm71_vm4, %vm70_vm3  ;;  %423 = vmatpush3.bf16.msk.msra.mxu0 %vm420_vm2, %v458_v12 }
   0xa   :  { %33 = vrot.lane.b32.xlu0 %v13_v9, %s457_s10  ;;  %35 = vrot.lane.b32.xlu1 %v14_v10, %s457_s10  ;;  %p440_p3 = por %p439_p2, %p438_p1 }
   0xb   :  { %425 = vmatprep.subr.msk.bf16.mxu1 %vm424_vm5, %v458_v12 }
   0xc   :  { %427 = vmatpush3.bf16.msk.msra.mxu1 %vm424_vm5, %v458_v12  ;;  %p441_p4 = pnand %p440_p3, %p434_p0 }
   0xe   :  { %37 = vrot.lane.b32.xlu0 %v15_v13, %s457_s10  ;;  %39 = vrot.lane.b32.xlu1 %v16_v14, %s457_s10 }
  0x74   :  { %v26_v15 = vpop.permute.xlu0 %25  ;;  %v30_v16 = vpop.permute.xlu1 %29 }
  0x75   :  { %v49_v17 = vmax.f32 %v9_v0, %v26_v15  ;;  %v51_v18 = vmax.f32 %v11_v1, %v30_v16 }
  0x77   :  { %392 = vmatprep.mubr.msk.f32.mxu0 %vm76_vm6, %v49_v17  ;;  %408 = vmatprep.mubr.msk.f32.mxu1 %vm76_vm6, %v49_v17 }
  0x78   :  { %v28_v19 = vpop.permute.xlu0 %27  ;;  %v32_v20 = vpop.permute.xlu1 %31 }
  0x79   :  { %v50_v21 = vmax.f32 %v10_v3, %v28_v19  ;;  %v52_v22 = vmax.f32 %v12_v4, %v32_v20 }
  0x7b   :  { %393 = vmatmul.mubr.msk.f32.vlgmr.msra.gmra.mrb[0].mxu0 %vm76_vm6, %v50_v21  ;;  %409 = vmatmul.mubr.msk.f32.vlgmr.msra.gmra.mrb[0].mxu1 %vm76_vm6, %v50_v21 }
  0x7c   :  { %395 = vmatprep.mubr.msk.f32.mxu0 %vm76_vm6, %v51_v18  ;;  %411 = vmatprep.mubr.msk.f32.mxu1 %vm76_vm6, %v51_v18  ;;  %v34_v23 = vpop.permute.xlu0 %33  ;;  %v36_v24 = vpop.permute.xlu1 %35 }
  0x7d   :  { %v53_v25 = vmax.f32 %v13_v9, %v34_v23  ;;  %v54_v26 = vmax.f32 %v14_v10, %v36_v24 }
  0x7f   :  { %396 = vmatmul.mubr.msk.f32.gmra.mrb[2].mxu0 %vm76_vm6, %v52_v22  ;;  %412 = vmatmul.mubr.msk.f32.gmra.mrb[2].mxu1 %vm76_vm6, %v52_v22 }
  0x80   :  { %398 = vmatprep.mubr.msk.f32.mxu0 %vm76_vm6, %v53_v25  ;;  %414 = vmatprep.mubr.msk.f32.mxu1 %vm76_vm6, %v53_v25  ;;  %v38_v27 = vpop.permute.xlu0 %37  ;;  %v40_v28 = vpop.permute.xlu1 %39 }
  0x81   :  { %v55_v29 = vmax.f32 %v15_v13, %v38_v27  ;;  %v56_v30 = vmax.f32 %v16_v14, %v40_v28 }
  0x83   :  { %399 = vmatmul.mubr.msk.f32.gmra.mrb[4].mxu0 %vm76_vm6, %v54_v26  ;;  %415 = vmatmul.mubr.msk.f32.gmra.mrb[4].mxu1 %vm76_vm6, %v54_v26 }
  0x84   :  { %401 = vmatprep.mubr.msk.f32.mxu0 %vm76_vm6, %v55_v29  ;;  %417 = vmatprep.mubr.msk.f32.mxu1 %vm76_vm6, %v55_v29 }
  0x87   :  { %402 = vmatmul.mubr.msk.f32.gmra.mrb[6].mxu0 %vm76_vm6, %v56_v30  ;;  %418 = vmatmul.mubr.msk.f32.gmra.mrb[6].mxu1 %vm76_vm6, %v56_v30 }
 0x14e   :  { %v394_v31 = vpop.f32.mrb[0].mxu0  ;;  %v410_v32 = vpop.f32.mrb[0].mxu1 }
 0x14f   :  { %v312_v33 = vmax.f32 %v394_v31, %v410_v32  ;;  %v167_v34 = vpop.f32.mrb[1].mxu0  ;;  %v272_v35 = vpop.f32.mrb[1].mxu1 }
 0x150   :  { %v311_v36 = vmax.f32 %v167_v34, %v272_v35 }
 0x151   :  { %321 = vst.msk [vmem:[#allocation2 + $0x8] sm:$0xff] %vm319_vm7, %v312_v33 }
 0x152   :  { %320 = vst.msk [vmem:[#allocation2] sm:$0xff] %vm319_vm7, %v311_v36  ;;  %v397_v37 = vpop.f32.mrb[2].mxu0  ;;  %v413_v38 = vpop.f32.mrb[2].mxu1 }
 0x153   :  { %v314_v39 = vmax.f32 %v397_v37, %v413_v38  ;;  %v177_v40 = vpop.f32.mrb[3].mxu0  ;;  %v282_v41 = vpop.f32.mrb[3].mxu1 }
 0x154   :  { %v313_v42 = vmax.f32 %v177_v40, %v282_v41 }
 0x155   :  { %323 = vst.msk [vmem:[#allocation2 + $0x18] sm:$0xff] %vm319_vm7, %v314_v39 }
 0x156   :  { %322 = vst.msk [vmem:[#allocation2 + $0x10] sm:$0xff] %vm319_vm7, %v313_v42  ;;  %v400_v43 = vpop.f32.mrb[4].mxu0  ;;  %v416_v44 = vpop.f32.mrb[4].mxu1 }
 0x157   :  { %v316_v45 = vmax.f32 %v400_v43, %v416_v44  ;;  %v187_v46 = vpop.f32.mrb[5].mxu0  ;;  %v292_v47 = vpop.f32.mrb[5].mxu1 }
 0x158   :  { %v315_v48 = vmax.f32 %v187_v46, %v292_v47 }
 0x159   :  { %325 = vst.msk [vmem:[#allocation2 + $0x28] sm:$0xff] %vm319_vm7, %v316_v45 }
 0x15a   :  { %324 = vst.msk [vmem:[#allocation2 + $0x20] sm:$0xff] %vm319_vm7, %v315_v48  ;;  %v403_v49 = vpop.f32.mrb[6].mxu0  ;;  %v419_v50 = vpop.f32.mrb[6].mxu1 }
 0x15b   :  { %v318_v51 = vmax.f32 %v403_v49, %v419_v50  ;;  %v197_v52 = vpop.f32.mrb[7].mxu0  ;;  %v302_v53 = vpop.f32.mrb[7].mxu1 }
 0x15c   :  { %v317_v54 = vmax.f32 %v197_v52, %v302_v53 }
 0x15d   :  { %327 = vst.msk [vmem:[#allocation2 + $0x38] sm:$0xff] %vm319_vm7, %v318_v51 }
 0x15e   :  { %326 = vst.msk [vmem:[#allocation2 + $0x30] sm:$0xff] %vm319_vm7, %v317_v54 }
 0x15f   :  { %444 = shalt.err (!%p441_p4)
}
 0x160   :  { %s445_s27 = scalar_lea.hbm %s541_s1, 1024 }
 0x161   :  { %p446_p5 = scmp.ne.s32.totalorder %s541_s1, %s445_s27  ;;  %p449_p6 = scmp.lt.u32.totalorder %s445_s27, %s541_s1 }
 0x163   :  { %p451_p7 = pnand %p449_p6, %p446_p5 }
 0x165   :  { %454 = shalt.err (!%p451_p7)
}
 0x166   :  { %s460_s3 = smov 128   ;;  %s461_s4 = smov 8  }
 0x167   :  { %339 = dma.vmem_to_hbm [thread:$0]  %s334_s23, 1024, %s541_s1, [#allocation3], %s460_s3, %s460_s3, %s461_s4  }
 0x168   :  { %455 = dma.done.wait [#allocation3], 1024  }
 0x169   :  { %456 = vsyncadd [#allocation3], 4294966272 }
 0x16a   :  { %343 = vsyncpa [#allocation3], 1 }

</bundles_post_ra>
